<compile_context>
chip_gen: v6e
topology: v6e:2x2x1
jax: 0.10.0
libtpu: 0.0.40
codegen_flags: <defaults>
</compile_context>

<pallas_src>
import functools

import numpy as np
import jax
import jax.numpy as jnp
from jax.experimental import pallas as pl
from jax.experimental.pallas import tpu as pltpu

EPS = 1e-5          # BatchNorm3d default eps
NEG_SLOPE = 1e-5    # LeakyReLU(1e-05)


# ---------------------------------------------------------------------------
# Pallas kernels
# ---------------------------------------------------------------------------
def _stats_kernel(x_ref, o_ref):
    """Accumulate lane-dense per-(w,c) sum / sum-of-squares across the batch grid.

    Input block is the lane-dense (D*H, W*C) view; the tiny fold over the W
    lane-groups down to (2, C) is done by the wrapper.
    """
    @pl.when(pl.program_id(0) == 0)
    def _():
        o_ref[...] = jnp.zeros_like(o_ref)

    x = x_ref[0]                                            # (D*H, W*C) f32
    s = jnp.sum(x, axis=0, keepdims=True)                   # (1, W*C)
    ss = jnp.sum(x * x, axis=0, keepdims=True)              # (1, W*C)
    o_ref[...] = o_ref[...] + jnp.concatenate([s, ss], axis=0)


def _bn_relu_conv_kernel(*refs, dims, cin, cout, has_residual, emit_stats,
                         neg_slope):
    """Fused: affine BN -> LeakyReLU -> 3x3x3 conv (pad 1) [+ residual] [+ stats]."""
    # Ref order: x, scale, bias, w, b, [res], o, [stats], col_scratch
    it = iter(refs)
    x_ref = next(it)
    scale_ref = next(it)
    bias_ref = next(it)
    w_ref = next(it)
    b_ref = next(it)
    res_ref = next(it) if has_residual else None
    o_ref = next(it)
    stats_ref = next(it) if emit_stats else None
    col_ref = next(it)

    D, H, W = dims
    dhw = D * H * W
    first = pl.program_id(0) == 0

    # --- one-time init: zero the halo/scratch and the stats accumulator ----
    # The interior of col_ref is fully overwritten every grid step; the halo
    # (d/h padding planes and the w=0 / w=W-1 kw-corner strips) is never
    # written again, so a single zero-fill at step 0 suffices.
    @pl.when(first)
    def _():
        col_ref[...] = jnp.zeros_like(col_ref)

    if emit_stats:
        @pl.when(first)
        def _():
            stats_ref[...] = jnp.zeros_like(stats_ref)

    # --- BN affine + LeakyReLU on the lane-dense (D*H, W*Cin) view ----------
    x = x_ref[0]                                            # (D*H, W*Cin) f32
    a = x * scale_ref[...] + bias_ref[...]                  # broadcast (1, W*Cin)
    a = jnp.where(a >= 0, a, neg_slope * a)
    a4 = a.reshape(D, H, W, cin).astype(jnp.bfloat16)       # single relayout

    # --- scatter into the kw-unrolled scratch (im2col along W) --------------
    # col[d+1, h+1, w, kw*Cin + c] = act[d, h, w + kw - 1, c]   (zero outside)
    col_ref[1:D + 1, 1:H + 1, 1:W, 0:cin] = a4[:, :, 0:W - 1, :]            # kw=0
    col_ref[1:D + 1, 1:H + 1, :, cin:2 * cin] = a4                          # kw=1
    col_ref[1:D + 1, 1:H + 1, 0:W - 1, 2 * cin:3 * cin] = a4[:, :, 1:W, :]  # kw=2

    # --- 3x3x3 conv: 9 bf16 MXU matmuls with K = 3*Cin, f32 accumulation ----
    acc = jnp.zeros((dhw, cout), jnp.float32)
    for kd in range(3):
        for kh in range(3):
            lhs = col_ref[kd:kd + D, kh:kh + H, :, :].reshape(dhw, 3 * cin)
            acc = acc + jnp.dot(lhs, w_ref[kd * 3 + kh],
                                preferred_element_type=jnp.float32)
    acc = acc + b_ref[...]                                  # bias added once

    # --- fused per-channel stats of the conv output (feeds the next BN) -----
    if emit_stats:
        s = jnp.sum(acc, axis=0, keepdims=True)             # (1, Cout)
        ss = jnp.sum(acc * acc, axis=0, keepdims=True)      # (1, Cout)
        stats_ref[...] = stats_ref[...] + jnp.concatenate([s, ss], axis=0)

    # --- lane-dense (D*H, W*Cout) output (+ residual), unmasked wide stores -
    out = acc.reshape(D * H, W * cout)
    if has_residual:
        out = out + res_ref[0]
    o_ref[0] = out.astype(o_ref.dtype)


# ---------------------------------------------------------------------------
# pallas_call wrappers
# ---------------------------------------------------------------------------
def channel_stats(xw, c):
    """xw: lane-dense (N, D*H, W*C) -> (2, C) [sum, sum_of_squares] per channel."""
    n, dh, wc = xw.shape
    w = wc // c
    part = pl.pallas_call(
        _stats_kernel,
        out_shape=jax.ShapeDtypeStruct((2, wc), jnp.float32),
        grid_spec=pltpu.PrefetchScalarGridSpec(
            num_scalar_prefetch=0,
            grid=(n,),
            in_specs=[pl.BlockSpec((1, dh, wc), lambda i: (i, 0, 0))],
            out_specs=pl.BlockSpec((2, wc), lambda i: (0, 0)),
        ),
        compiler_params=pltpu.CompilerParams(dimension_semantics=("arbitrary",)),
    )(xw)
    # Tiny fold of the W lane-groups, done outside the kernel.
    return part.reshape(2, w, c).sum(axis=1)


def bn_relu_conv(xw, scale, bias, w27, b, dims, cin, residual=None,
                 emit_stats=False):
    """xw: lane-dense (N, D*H, W*Cin); w27: (27, Cin, Cout).

    Returns lane-dense (N, D*H, W*Cout) [and (2, Cout) stats if emit_stats].
    """
    N, dh, wcin = xw.shape
    D, H, W = dims
    cout = w27.shape[-1]
    assert wcin == W * cin
    if residual is not None:
        # Residual add requires matching channel count (Cin == Cout).
        assert residual.shape == (N, dh, W * cout), "residual needs Cin == Cout"

    kernel = functools.partial(
        _bn_relu_conv_kernel, dims=dims, cin=cin, cout=cout,
        has_residual=residual is not None, emit_stats=emit_stats,
        neg_slope=NEG_SLOPE)

    # Pre-fold BN into a per-channel affine, tiled W times so it broadcasts
    # over the lane-dense rows; weights re-packed as 9 slabs of (3*Cin, Cout)
    # and cast to bf16 for the MXU.
    scale_t = jnp.tile(scale, W).reshape(1, W * cin).astype(jnp.float32)
    bias_t = jnp.tile(bias, W).reshape(1, W * cin).astype(jnp.float32)
    w_slab = w27.reshape(9, 3 * cin, cout).astype(jnp.bfloat16)

    in_specs = [
        pl.BlockSpec((1, dh, W * cin), lambda i: (i, 0, 0)),
        pl.BlockSpec((1, W * cin), lambda i: (0, 0)),
        pl.BlockSpec((1, W * cin), lambda i: (0, 0)),
        pl.BlockSpec((9, 3 * cin, cout), lambda i: (0, 0, 0)),
        pl.BlockSpec((1, cout), lambda i: (0, 0)),
    ]
    args = [xw, scale_t, bias_t, w_slab, b.reshape(1, cout)]
    if residual is not None:
        in_specs.append(pl.BlockSpec((1, dh, W * cout), lambda i: (i, 0, 0)))
        args.append(residual)

    out_shapes = [jax.ShapeDtypeStruct((N, dh, W * cout), jnp.float32)]
    out_specs = [pl.BlockSpec((1, dh, W * cout), lambda i: (i, 0, 0))]
    if emit_stats:
        out_shapes.append(jax.ShapeDtypeStruct((2, cout), jnp.float32))
        out_specs.append(pl.BlockSpec((2, cout), lambda i: (0, 0)))

    return pl.pallas_call(
        kernel,
        out_shape=tuple(out_shapes) if emit_stats else out_shapes[0],
        grid_spec=pltpu.PrefetchScalarGridSpec(
            num_scalar_prefetch=0,
            grid=(N,),
            in_specs=in_specs,
            out_specs=tuple(out_specs) if emit_stats else out_specs[0],
            scratch_shapes=[
                pltpu.VMEM((D + 2, H + 2, W, 3 * cin), jnp.bfloat16)],
        ),
        # "arbitrary": the col scratch is zeroed only at step 0 and the stats
        # output accumulates across the grid, so steps must stay on one core.
        compiler_params=pltpu.CompilerParams(dimension_semantics=("arbitrary",)),
    )(*args)


# ---------------------------------------------------------------------------
# VoxRes forward (glue in plain JAX)
# ---------------------------------------------------------------------------
def voxres_forward(x_ndhwc, p):
    N, D, H, W, C = x_ndhwc.shape
    dhw = D * H * W
    count = N * dhw
    xw = x_ndhwc.reshape(N, D * H, W * C)      # lane-dense view (no data move)

    # BN1 (training-mode batch stats) folded into a per-channel affine.
    # NOTE: var = E[x^2] - E[x]^2 in f32; adequate for normalized-scale inputs.
    st1 = channel_stats(xw, C)
    mean1 = st1[0] / count
    var1 = st1[1] / count - mean1 * mean1
    scale1 = p["gamma1"] * jax.lax.rsqrt(var1 + EPS)
    bias1 = p["beta1"] - mean1 * scale1

    # Layer 1: BN1 -> LeakyReLU -> conv_1, with BN2 stats fused in-kernel.
    y1, st2 = bn_relu_conv(xw, scale1, bias1, p["w1"], p["b1"], (D, H, W), C,
                           emit_stats=True)
    mean2 = st2[0] / count
    var2 = st2[1] / count - mean2 * mean2
    scale2 = p["gamma2"] * jax.lax.rsqrt(var2 + EPS)
    bias2 = p["beta2"] - mean2 * scale2

    # Layer 2: BN2 -> LeakyReLU -> conv_2 + residual (original input).
    y2 = bn_relu_conv(y1, scale2, bias2, p["w2"], p["b2"], (D, H, W), 64,
                      residual=xw)
    return y2.reshape(N, D, H, W, 64)


def init_params(key, in_dims, mid=64):
    k1, k2, k3, k4 = jax.random.split(key, 4)
    fan1 = in_dims * 27
    fan2 = mid * 27
    return dict(
        # conv weights stored as (27 taps [kd*9+kh*3+kw], Cin, Cout)
        w1=jax.random.normal(k1, (27, in_dims, mid), jnp.float32) * np.sqrt(2.0 / fan1),
        b1=jax.random.uniform(k2, (mid,), jnp.float32,
                              -1.0 / np.sqrt(fan1), 1.0 / np.sqrt(fan1)),
        w2=jax.random.normal(k3, (27, mid, mid), jnp.float32) * np.sqrt(2.0 / fan2),
        b2=jax.random.uniform(k4, (mid,), jnp.float32,
                              -1.0 / np.sqrt(fan2), 1.0 / np.sqrt(fan2)),
        gamma1=jnp.ones((in_dims,), jnp.float32),
        beta1=jnp.zeros((in_dims,), jnp.float32),
        gamma2=jnp.ones((mid,), jnp.float32),
        beta2=jnp.zeros((mid,), jnp.float32),
    )


# ---------------------------------------------------------------------------
# Pure-JAX reference (full f32, for verification)
# ---------------------------------------------------------------------------
def voxres_reference(x_ndhwc, p):
    def bn(v, gamma, beta):
        mean = jnp.mean(v, axis=(0, 1, 2, 3))
        var = jnp.var(v, axis=(0, 1, 2, 3))           # biased, like PyTorch BN
        return (v - mean) * (gamma / jnp.sqrt(var + EPS)) + beta

    def lrelu(v):
        return jnp.where(v >= 0, v, NEG_SLOPE * v)

    def conv(v, w27, b):
        cin, cout = w27.shape[1], w27.shape[2]
        w = w27.reshape(3, 3, 3, cin, cout)
        y = jax.lax.conv_general_dilated(
            v, w, window_strides=(1, 1, 1),
            padding=((1, 1), (1, 1), (1, 1)),
            dimension_numbers=("NDHWC", "DHWIO", "NDHWC"),
            precision=jax.lax.Precision.HIGHEST)
        return y + b

    a = conv(lrelu(bn(x_ndhwc, p["gamma1"], p["beta1"])), p["w1"], p["b1"])
    a = conv(lrelu(bn(a, p["gamma2"], p["beta2"])), p["w2"], p["b2"])
    return a + x_ndhwc


if __name__ == "__main__":
    key = jax.random.PRNGKey(0)
    kx, kp = jax.random.split(key)

    # Residual add requires in_dims == 64 (conv_2 outputs 64 channels).
    N, C, D, H, W = 2, 64, 8, 8, 8
    x_ncdhw = jax.random.normal(kx, (N, C, D, H, W), jnp.float32)   # PyTorch layout
    x = jnp.transpose(x_ncdhw, (0, 2, 3, 4, 1))                     # -> NDHWC

    params = init_params(kp, in_dims=C)

    out = voxres_forward(x, params)
    out = jax.block_until_ready(out)

    ref = voxres_reference(x, params)
    # Tolerance accounts for bf16 MXU operands (f32 accumulation) vs. the
    # full-f32 reference; any structural bug (wrong tap / BN / residual)
    # produces O(0.1-1) errors and is still caught.
    np.testing.assert_allclose(np.asarray(out), np.asarray(ref),
                               rtol=3e-2, atol=3e-2)

    print("KERNEL_OK")
</pallas_src>

<mosaic_0001>
module attributes {stable_mosaic.version = 11 : i64} {
  func.func @_stats_kernel(%arg0: i32, %arg1: memref<1x64x512xf32, #tpu.memory_space<vmem>>, %arg2: memref<2x512xf32, #tpu.memory_space<vmem>>) attributes {dimension_semantics = [#tpu.dimension_semantics<arbitrary>], iteration_bounds = array<i64: 2>, scalar_prefetch = 0 : i64, scratch_operands = 0 : i64, tpu.core_type = #tpu.core_type<tc>, window_params = [{transform_indices = @transform_0, window_bounds = array<i64: 1, 64, 512>}, {pipeline_mode = #tpu.pipeline_mode<synchronous>, transform_indices = @transform_1, window_bounds = array<i64: 2, 512>}]} {
    %c0_i32 = arith.constant 0 : i32
    %0 = arith.cmpi eq, %arg0, %c0_i32 : i32
    %1 = arith.extui %0 : i1 to i32
    %c0_i32_0 = arith.constant 0 : i32
    %2 = arith.cmpi ne, %1, %c0_i32_0 : i32
    scf.if %2 {
      %cst_8 = arith.constant 0.000000e+00 : f32
      %14 = vector.broadcast %cst_8 : f32 to vector<2x512xf32>
      %c0_9 = arith.constant 0 : index
      %c0_10 = arith.constant 0 : index
      %15 = vector.load %arg2[%c0_9, %c0_10] : memref<2x512xf32, #tpu.memory_space<vmem>>, vector<2x512xf32>
      tpu.vector_store %arg2[%c0_9, %c0_10], %14 {strides = array<i32>} : memref<2x512xf32, #tpu.memory_space<vmem>>, vector<2x512xf32>,
    } else {
    }
    %c0 = arith.constant 0 : index
    %c0_1 = arith.constant 0 : index
    %c0_2 = arith.constant 0 : index
    %3 = vector.load %arg1[%c0, %c0_1, %c0_2] : memref<1x64x512xf32, #tpu.memory_space<vmem>>, vector<1x64x512xf32>
    %4 = vector.shape_cast %3 : vector<1x64x512xf32> to vector<64x512xf32>
    %cst = arith.constant dense<0.000000e+00> : vector<512xf32>
    %5 = vector.multi_reduction <add>, %4, %cst [0] : vector<64x512xf32> to vector<512xf32>
    %6 = vector.shape_cast %5 : vector<512xf32> to vector<1x512xf32>
    %7 = arith.mulf %4, %4 : vector<64x512xf32>
    %cst_3 = arith.constant dense<0.000000e+00> : vector<512xf32>
    %8 = vector.multi_reduction <add>, %7, %cst_3 [0] : vector<64x512xf32> to vector<512xf32>
    %9 = vector.shape_cast %8 : vector<512xf32> to vector<1x512xf32>
    %c0_4 = arith.constant 0 : index
    %c0_5 = arith.constant 0 : index
    %10 = vector.load %arg2[%c0_4, %c0_5] : memref<2x512xf32, #tpu.memory_space<vmem>>, vector<2x512xf32>
    %11 = tpu.concatenate %6, %9 in 0 : vector<1x512xf32>, vector<1x512xf32> -> vector<2x512xf32>
    %12 = arith.addf %10, %11 : vector<2x512xf32>
    %c0_6 = arith.constant 0 : index
    %c0_7 = arith.constant 0 : index
    %13 = vector.load %arg2[%c0_6, %c0_7] : memref<2x512xf32, #tpu.memory_space<vmem>>, vector<2x512xf32>
    tpu.vector_store %arg2[%c0_6, %c0_7], %12 {strides = array<i32>} : memref<2x512xf32, #tpu.memory_space<vmem>>, vector<2x512xf32>,
    return
  }
  func.func @transform_0(%arg0: i32) -> (i32, i32, i32) {
    %c0_i32 = arith.constant 0 : i32
    %c0_i32_0 = arith.constant 0 : i32
    %c0_i32_1 = arith.constant 0 : i32
    return %arg0, %c0_i32, %c0_i32_0 : i32, i32, i32
  }
  func.func @transform_1(%arg0: i32) -> (i32, i32) {
    %c0_i32 = arith.constant 0 : i32
    %c0_i32_0 = arith.constant 0 : i32
    %c0_i32_1 = arith.constant 0 : i32
    return %c0_i32, %c0_i32_0 : i32, i32
  }
}

</mosaic_0001>

<bundles_post_ra>
// kernel: tpu_custom_call.1
= control target key start
LH: loop header
LB: loop body
LE: loop exit
PB: predicated region body
PF: predicated region fallthrough
CT: control target
= control target key end

     0   :  { %6 = vsyncpa [#allocation3], 0  ;;  %s702_s0 = inlined_call_operand.hbm [shape: f32[2,64,512], index: 0, kind: input, shape index: {}]   ;;  %s703_s1 = inlined_call_operand.hbm [shape: f32[2,512], index: 1, kind: output, shape index: {}]  }
   0x1   :  { %8 = vsyncpa [#allocation3 + $0x1], 0 }
   0x2   :  { %9 = vsyncpa [#allocation4], 0  ;;  %s555_s6 = smov 0   ;;  %s557_s7 = smov 0  }
   0x3   :  { %s559_s8 = smov 0   ;;  %s561_s9 = smov 0  }
   0x4 LB: > { %s574_s10 = sadd.s32 4294967295, %s537_s9   ;;  %s577_s11 = sadd.s32 1, %s537_s9   ;;  %s537_s9 = sphi %s561_s9, %s712_s9   ;;  %s533_s8 = sphi %s559_s8, %s711_s8   ;;  %s529_s7 = sphi %s557_s7, %s710_s7   ;;  %s525_s6 = sphi %s555_s6, %s709_s6  }
   0x5   : > { %s19_s12 = ssub.s32 %s537_s9, %s577_s11  ;;  %s22_s13 = sadd.s32 1, %s533_s8 }
   0x6   : > { %p20_p0 = scmp.eq.s32.totalorder %s19_s12, 0  ;;  %p29_p1 = scmp.ne.s32.totalorder %s533_s8, %s529_s7 }
   0x7   : > { %p30_p2 = scmp.eq.s32.totalorder %s537_s9, 0  ;;  %p35_p3 = scmp.ne.s32.totalorder %s529_s7, %s525_s6 }
   0x8   : > { %s587_s14 = scalar_select %p20_p0, %s533_s8, %s22_s13  }
   0x9   : > { %p31_p4 = por %p30_p2, %p29_p1  ;;  %p36_p5 = scmp.eq.s32.totalorder %s574_s10, 0 }
   0xa   : > { %p407_p6 = scmp.lt.s32.totalorder %s537_s9, 2  ;;  %s80_s16 = sand.u32 1, %s533_s8  }
   0xb   : > { %p591_p7 = por %p36_p5, %p35_p3  ;;  %s386_s17 = sshll.u32 %s80_s16, 8 }
   0xc   : > { %s396_s18 = sshll.u32 %s537_s9, 12  ;;  %s84_s22 = scalar_lea.vmem [#allocation2], %s386_s17 }
   0xd   : > { %s705_s15 = scalar_select %p591_p7, 1, 0 }
   0xe   : > { %s600_s21 = scalar_lea.hbm %s702_s0, %s396_s18  ;;  %s91_s23 = sshll.u32 %s84_s22, 4  ;;  %s602_s23 = int_to_ptr.vmem [resolvable:$true] %s91_s23 }
   0xf   : > { %p604_p8 = pnand %p407_p6, %p31_p4  ;;  %s609_s25 = scalar_lea.sflag [#allocation3], %s80_s16 }
  0x10   : > { %s447_s26 = scalar_lea.hbm %s600_s21, 4096  ;;  %s452_s29 = scalar_lea.hbm %s702_s0, 8192 }
  0x11   : > { %p448_p10 = scmp.ne.s32.totalorder %s600_s21, %s447_s26  ;;  %p449_p11 = pneg %p604_p8 }
  0x12   : > { %p453_p0 = scmp.lt.s32.totalorder %s600_s21, %s702_s0  ;;  %p454_p1 = scmp.lt.s32.totalorder %s452_s29, %s447_s26 }
  0x13   : > { %p450_p12 = pnand %p449_p11, %p448_p10 }
  0x14   : > { %p455_p2 = por %p454_p1, %p453_p0 }
  0x15   : > { %p451_p13 = pneg %p450_p12 }
  0x17   : > { %p456_p3 = pnand %p455_p2, %p451_p13 }
  0x19   : > { %459 = shalt.err (!%p456_p3)
}
  0x1a   : > { %s460_s3 = scalar_lea.vmem %s602_s23, 4096  ;;  %s539_s4 = smov [#allocation2]  }
  0x1b   : > { %p461_p4 = scmp.ne.s32.totalorder %s602_s23, %s460_s3  ;;  %s465_s5 = sshll.u32 %s539_s4, 4  ;;  %s466_s5 = int_to_ptr.vmem [resolvable:$false] %s465_s5 }
  0x1c   : > { %s467_s6 = scalar_lea.vmem %s466_s5, 8192  ;;  %p468_p10 = scmp.lt.s32.totalorder %s602_s23, %s466_s5 }
  0x1d   : > { %p463_p5 = pnand %p461_p4, %p449_p11  ;;  %p469_p12 = scmp.lt.s32.totalorder %s467_s6, %s460_s3 }
  0x1f   : > { %p464_p6 = pneg %p463_p5  ;;  %p470_p9 = por %p469_p12, %p468_p10 }
  0x21   : > { %p471_p7 = pnand %p470_p9, %p464_p6 }
  0x23   : > { %474 = shalt.err (!%p471_p7)
}
  0x24   : > { %s540_s12 = smov 512   ;;  %s541_s13 = smov 32  }
  0x25   : > { %406 = dma.hbm_to_vmem [thread:$0]  (!%p604_p8), %s600_s21, 4096, %s602_s23, %s609_s25, %s540_s12, %s540_s12, %s541_s13  }
  0x26   : > { %p99_p11 = scmp.lt.s32.totalorder %s537_s9, 3  ;;  %p707_p13 = scmp.ge.s32.totalorder %s537_s9, 1 }
  0x28   : > { %p100_p0 = pnand %p707_p13, %p99_p11 }
  0x29   : > { %s105_s16 = sand.u32 (!%p100_p0), 1, %s529_s7   ;;  %p708_p7 = scmp.ne.s32.totalorder (!%p100_p0), %s705_s15, 0 }
  0x2a   : > { %103 = sbr.rel (%p100_p0) target bundleno = 112 (0x70), region = 24  ;;  %s390_s17 = sshll.u32 (!%p100_p0), %s105_s16, 8 }
  0x2b   : > { %s106_s18 = scalar_lea.sflag (!%p100_p0), [#allocation3], %s105_s16  ;;  %s634_s19 = scalar_lea.vmem (!%p100_p0), [#allocation2], %s390_s17 }
  0x2f   : > { %516 = dma.done.wait (%p708_p7), %s106_s18, 4096  }
  0x30   : > { %518 = vsyncadd (%p708_p7), %s106_s18, 4294963200  ;;  %p391_p9 = scmp.ne.s32.totalorder %s574_s10, 0 }
  0x32   : > { %126 = sbr.rel (%p391_p9) target bundleno = 57 (0x39), region = 32 }
  0x37   : > { %v542_v0 = vmov 0.0  }
  0x38   : > { %127 = vst [vmem:[#allocation5] sm:$0xff] %v542_v0 }
  0x39 PF: > { %v128_v1 = vld [vmem:[%s634_s19] sm:$0xff]  ;;  %v129_v2 = vld [vmem:[%s634_s19 + $0x8] sm:$0xff]  ;;  %v130_v3 = vld [vmem:[%s634_s19 + $0x10] sm:$0xff]  ;;  %vm297_vm0 = vcmask 1040384   ;;  %s544_s9 = smov [#allocation5]   ;;  %p408_p8 = scmp.eq.s32.totalorder %s574_s10, 1 }
  0x3a   : > { %v132_v4 = vld [vmem:[%s634_s19 + $0x20] sm:$0xff]  ;;  %v133_v5 = vld [vmem:[%s634_s19 + $0x28] sm:$0xff]  ;;  %v131_v6 = vld [vmem:[%s634_s19 + $0x18] sm:$0xff]  ;;  %v212_v27 = vmul.f32 %v128_v1, %v128_v1  ;;  %v213_v32 = vmul.f32 %v129_v2, %v129_v2  ;;  %v214_v33 = vmul.f32 %v130_v3, %v130_v3  ;;  %s333_s15 = sshll.u32 %s544_s9, 4  ;;  %s334_s15 = int_to_ptr.vmem [resolvable:$true] %s333_s15 }
  0x3b   : > { %v134_v7 = vld [vmem:[%s634_s19 + $0x30] sm:$0xff]  ;;  %v135_v8 = vld [vmem:[%s634_s19 + $0x38] sm:$0xff]  ;;  %v160_v9 = vadd.f32 %v132_v4, %v128_v1  ;;  %v173_v10 = vadd.f32 %v133_v5, %v129_v2  ;;  %v136_v11 = vld [vmem:[%s634_s19 + $0x40] sm:$0xff]  ;;  %v215_v38 = vmul.f32 %v131_v6, %v131_v6  ;;  %v216_v39 = vmul.f32 %v132_v4, %v132_v4  ;;  %s475_s20 = scalar_lea.vmem %s334_s15, 128  ;;  %p482_p4 = scmp.lt.s32.totalorder %s334_s15, %s334_s15 }
  0x3c   : > { %v137_v12 = vld [vmem:[%s634_s19 + $0x48] sm:$0xff]  ;;  %v186_v13 = vadd.f32 %v134_v7, %v130_v3  ;;  %v199_v14 = vadd.f32 %v135_v8, %v131_v6  ;;  %v138_v15 = vld [vmem:[%s634_s19 + $0x50] sm:$0xff]  ;;  %v139_v16 = vld [vmem:[%s634_s19 + $0x58] sm:$0xff]  ;;  %v217_v44 = vmul.f32 %v133_v5, %v133_v5  ;;  %v218_v45 = vmul.f32 %v134_v7, %v134_v7  ;;  %p476_p1 = scmp.ne.s32.totalorder %s334_s15, %s475_s20  ;;  %p483_p5 = scmp.lt.s32.totalorder %s475_s20, %s475_s20 }
  0x3d   : > { %v161_v17 = vadd.f32 %v160_v9, %v136_v11  ;;  %v174_v18 = vadd.f32 %v173_v10, %v137_v12  ;;  %v140_v19 = vld [vmem:[%s634_s19 + $0x60] sm:$0xff]  ;;  %v141_v20 = vld [vmem:[%s634_s19 + $0x68] sm:$0xff]  ;;  %v142_v23 = vld [vmem:[%s634_s19 + $0x70] sm:$0xff]  ;;  %v219_v50 = vmul.f32 %v135_v8, %v135_v8  ;;  %v220_v51 = vmul.f32 %v136_v11, %v136_v11 }
  0x3e   : > { %v187_v21 = vadd.f32 %v186_v13, %v138_v15  ;;  %v200_v22 = vadd.f32 %v199_v14, %v139_v16  ;;  %v143_v24 = vld [vmem:[%s634_s19 + $0x78] sm:$0xff]  ;;  %v144_v28 = vld [vmem:[%s634_s19 + $0x80] sm:$0xff]  ;;  %v145_v29 = vld [vmem:[%s634_s19 + $0x88] sm:$0xff]  ;;  %v221_v56 = vmul.f32 %v137_v12, %v137_v12  ;;  %v222_v57 = vmul.f32 %v138_v15, %v138_v15  ;;  %p477_p2 = pnand %p476_p1, %p408_p8  ;;  %p484_p6 = por %p483_p5, %p482_p4 }
  0x3f   : > { %v162_v25 = vadd.f32 %v161_v17, %v140_v19  ;;  %v175_v26 = vadd.f32 %v174_v18, %v141_v20  ;;  %v146_v34 = vld [vmem:[%s634_s19 + $0x90] sm:$0xff]  ;;  %v147_v35 = vld [vmem:[%s634_s19 + $0x98] sm:$0xff]  ;;  %v148_v40 = vld [vmem:[%s634_s19 + $0xa0] sm:$0xff]  ;;  %v223_v62 = vmul.f32 %v139_v16, %v139_v16  ;;  %v224_v63 = vmul.f32 %v140_v19, %v140_v19 }
  0x40   : > { %v188_v30 = vadd.f32 %v187_v21, %v142_v23  ;;  %v201_v31 = vadd.f32 %v200_v22, %v143_v24  ;;  %v149_v41 = vld [vmem:[%s634_s19 + $0xa8] sm:$0xff]  ;;  %v150_v46 = vld [vmem:[%s634_s19 + $0xb0] sm:$0xff]  ;;  %v151_v47 = vld [vmem:[%s634_s19 + $0xb8] sm:$0xff]  ;;  %v225_v3 = vmul.f32 %v141_v20, %v141_v20  ;;  %v226_v4 = vmul.f32 %v142_v23, %v142_v23  ;;  %p478_p3 = pneg %p477_p2 }
  0x41   : > { %v163_v36 = vadd.f32 %v162_v25, %v144_v28  ;;  %v176_v37 = vadd.f32 %v175_v26, %v145_v29  ;;  %v152_v52 = vld [vmem:[%s634_s19 + $0xc0] sm:$0xff]  ;;  %v153_v53 = vld [vmem:[%s634_s19 + $0xc8] sm:$0xff]  ;;  %v154_v58 = vld [vmem:[%s634_s19 + $0xd0] sm:$0xff]  ;;  %v227_v8 = vmul.f32 %v143_v24, %v143_v24  ;;  %v228_v9 = vmul.f32 %v144_v28, %v144_v28 }
  0x42   : > { %v189_v42 = vadd.f32 %v188_v30, %v146_v34  ;;  %v202_v43 = vadd.f32 %v201_v31, %v147_v35  ;;  %v155_v59 = vld [vmem:[%s634_s19 + $0xd8] sm:$0xff]  ;;  %v156_v0 = vld [vmem:[%s634_s19 + $0xe0] sm:$0xff]  ;;  %v157_v5 = vld [vmem:[%s634_s19 + $0xe8] sm:$0xff]  ;;  %v229_v10 = vmul.f32 %v145_v29, %v145_v29  ;;  %v230_v14 = vmul.f32 %v146_v34, %v146_v34  ;;  %p485_p10 = pnand %p484_p6, %p478_p3 }
  0x43   : > { %v164_v48 = vadd.f32 %v163_v36, %v148_v40  ;;  %v177_v49 = vadd.f32 %v176_v37, %v149_v41  ;;  %v158_v6 = vld [vmem:[%s634_s19 + $0xf0] sm:$0xff]  ;;  %v159_v11 = vld [vmem:[%s634_s19 + $0xf8] sm:$0xff]  ;;  %v231_v15 = vmul.f32 %v147_v35, %v147_v35  ;;  %v232_v18 = vmul.f32 %v148_v40, %v148_v40 }
  0x44   : > { %v190_v54 = vadd.f32 %v189_v42, %v150_v46  ;;  %v203_v55 = vadd.f32 %v202_v43, %v151_v47  ;;  %v233_v16 = vmul.f32 %v149_v41, %v149_v41  ;;  %v244_v19 = vadd.f32 %v216_v39, %v212_v27 }
  0x45   : > { %v165_v60 = vadd.f32 %v164_v48, %v152_v52  ;;  %v178_v61 = vadd.f32 %v177_v49, %v153_v53  ;;  %v234_v22 = vmul.f32 %v150_v46, %v150_v46  ;;  %v257_v25 = vadd.f32 %v217_v44, %v213_v32 }
  0x46   : > { %v191_v1 = vadd.f32 %v190_v54, %v154_v58  ;;  %v204_v2 = vadd.f32 %v203_v55, %v155_v59  ;;  %v270_v20 = vadd.f32 %v218_v45, %v214_v33  ;;  %v235_v23 = vmul.f32 %v151_v47, %v151_v47 }
  0x47   : > { %v166_v7 = vadd.f32 %v165_v60, %v156_v0  ;;  %v179_v12 = vadd.f32 %v178_v61, %v157_v5  ;;  %v236_v26 = vmul.f32 %v152_v52, %v152_v52  ;;  %v245_v30 = vadd.f32 %v244_v19, %v220_v51 }
  0x48   : > { %v192_v13 = vadd.f32 %v191_v1, %v158_v6  ;;  %v205_v17 = vadd.f32 %v204_v2, %v159_v11  ;;  %v283_v31 = vadd.f32 %v219_v50, %v215_v38  ;;  %v258_v29 = vadd.f32 %v257_v25, %v221_v56 }
  0x49   : > { %v167_v21 = vrot.slane %v166_v7, 4  ;;  %v180_v24 = vrot.slane %v179_v12, 4  ;;  %v271_v36 = vadd.f32 %v270_v20, %v222_v57  ;;  %v237_v42 = vmul.f32 %v153_v53, %v153_v53 }
  0x4a   : > { %v193_v28 = vrot.slane %v192_v13, 4  ;;  %v206_v37 = vrot.slane %v205_v17, 4  ;;  %v246_v34 = vadd.f32 %v245_v30, %v224_v63  ;;  %v284_v35 = vadd.f32 %v283_v31, %v223_v62 }
  0x4b   : > { %v168_v43 = vadd.f32 %v167_v21, %v166_v7  ;;  %v238_v40 = vmul.f32 %v154_v58, %v154_v58  ;;  %v259_v41 = vadd.f32 %v258_v29, %v225_v3  ;;  %v272_v27 = vadd.f32 %v271_v36, %v226_v4 }
  0x4c   : > { %v239_v39 = vmul.f32 %v155_v59, %v155_v59  ;;  %v240_v46 = vmul.f32 %v156_v0, %v156_v0  ;;  %v247_v32 = vadd.f32 %v246_v34, %v228_v9  ;;  %v285_v33 = vadd.f32 %v284_v35, %v227_v8 }
  0x4d   : > { %v181_v44 = vadd.f32 %v180_v24, %v179_v12  ;;  %v194_v45 = vadd.f32 %v193_v28, %v192_v13  ;;  %v260_v47 = vadd.f32 %v259_v41, %v229_v10  ;;  %v273_v38 = vadd.f32 %v272_v27, %v230_v14 }
  0x4e   : > { %v207_v48 = vadd.f32 %v206_v37, %v205_v17  ;;  %v241_v49 = vmul.f32 %v157_v5, %v157_v5  ;;  %v248_v50 = vadd.f32 %v247_v32, %v232_v18  ;;  %v286_v51 = vadd.f32 %v285_v33, %v231_v15 }
  0x4f   : > { %v169_v52 = vrot.slane %v168_v43, 2  ;;  %v242_v53 = vmul.f32 %v158_v6, %v158_v6  ;;  %v261_v54 = vadd.f32 %v260_v47, %v233_v16  ;;  %v274_v55 = vadd.f32 %v273_v38, %v234_v22 }
  0x50   : > { %v243_v56 = vmul.f32 %v159_v11, %v159_v11  ;;  %v249_v57 = vadd.f32 %v248_v50, %v236_v26  ;;  %v287_v58 = vadd.f32 %v286_v51, %v235_v23  ;;  %v182_v60 = vrot.slane %v181_v44, 2 }
  0x51   : > { %v195_v59 = vrot.slane %v194_v45, 2  ;;  %v262_v61 = vadd.f32 %v261_v54, %v237_v42  ;;  %v275_v62 = vadd.f32 %v274_v55, %v238_v40  ;;  %v208_v63 = vrot.slane %v207_v48, 2  ;;  %v296_v55 = vld [vmem:[#allocation5] sm:$0xff] }
  0x52   : > { %v250_v0 = vadd.f32 %v249_v57, %v240_v46  ;;  %v288_v1 = vadd.f32 %v287_v58, %v239_v39  ;;  %v170_v2 = vadd.f32 %v169_v52, %v168_v43  ;;  %v183_v8 = vadd.f32 %v182_v60, %v181_v44 }
  0x53   : > { %v263_v3 = vadd.f32 %v262_v61, %v241_v49  ;;  %v276_v4 = vadd.f32 %v275_v62, %v242_v53  ;;  %v196_v9 = vadd.f32 %v195_v59, %v194_v45  ;;  %v209_v12 = vadd.f32 %v208_v63, %v207_v48 }
  0x54   : > { %v251_v5 = vrot.slane %v250_v0, 4  ;;  %v289_v7 = vadd.f32 %v288_v1, %v243_v56  ;;  %v171_v14 = vrot.slane %v170_v2, 1  ;;  %v543_v19 = vmov 1983009808  }
  0x55   : > { %v264_v6 = vrot.slane %v263_v3, 4  ;;  %v277_v10 = vrot.slane %v276_v4, 4  ;;  %v309_v21 = vunpack.c.l.s4 %v543_v19  ;;  %v311_v22 = vlaneseq }
  0x56   : > { %v252_v11 = vadd.f32 %v251_v5, %v250_v0  ;;  %v290_v13 = vrot.slane %v289_v7, 4  ;;  %v184_v25 = vrot.slane %v183_v8, 1  ;;  %v197_v20 = vrot.slane %v196_v9, 1 }
  0x57   : > { %v265_v15 = vadd.f32 %v264_v6, %v263_v3  ;;  %v278_v17 = vadd.f32 %v277_v10, %v276_v4  ;;  %v210_v30 = vrot.slane %v209_v12, 1  ;;  %v172_v28 = vadd.f32 %v171_v14, %v170_v2 }
  0x58   : > { %v253_v18 = vrot.slane %v252_v11, 2  ;;  %v291_v16 = vadd.f32 %v290_v13, %v289_v7  ;;  %v310_v34 = vunpack.c.0.s8 %v309_v21  ;;  %v312_v35 = vshrl.u32 %v311_v22, 7 }
  0x59   : > { %v266_v23 = vrot.slane %v265_v15, 2  ;;  %v279_v26 = vrot.slane %v278_v17, 2  ;;  %v185_v43 = vadd.f32 %v184_v25, %v183_v8  ;;  %v198_v40 = vadd.f32 %v197_v20, %v196_v9 }
  0x5a   : > { %v254_v31 = vadd.f32 %v253_v18, %v252_v11  ;;  %v292_v24 = vrot.slane %v291_v16, 2  ;;  %v211_v39 = vadd.f32 %v210_v30, %v209_v12  ;;  %v313_v38 = vsub.s32 %v310_v34, %v312_v35 }
  0x5b   : > { %v267_v29 = vadd.f32 %v266_v23, %v265_v15  ;;  %v280_v36 = vadd.f32 %v279_v26, %v278_v17 }
  0x5c   : > { %v255_v37 = vrot.slane %v254_v31, 1  ;;  %v293_v42 = vadd.f32 %v292_v24, %v291_v16 }
  0x5d   : > { %v268_v41 = vrot.slane %v267_v29, 1  ;;  %v281_v27 = vrot.slane %v280_v36, 1 }
  0x5e   : > { %v256_v46 = vadd.f32 %v255_v37, %v254_v31  ;;  %v294_v32 = vrot.slane %v293_v42, 1 }
  0x5f   : > { %v269_v33 = vadd.f32 %v268_v41, %v267_v29  ;;  %v282_v44 = vadd.f32 %v281_v27, %v280_v36 }
  0x60   : > { %v295_v45 = vadd.f32 %v294_v32, %v293_v42  ;;  %v298_v47 = vsel %vm297_vm0, %v172_v28, %v256_v46 }
  0x61   : > { %v299_v48 = vsel %vm297_vm0, %v185_v43, %v269_v33  ;;  %v300_v49 = vsel %vm297_vm0, %v198_v40, %v282_v44 }
  0x62   : > { %v301_v50 = vsel %vm297_vm0, %v211_v39, %v295_v45  ;;  %v306_v51 = vcombine.low %v298_v47, %v299_v48 }
  0x63   : > { %v307_v52 = vcombine.low %v300_v49, %v301_v50 }
  0x64   : > { %v314_v53 = vrot.slane %v306_v51, %v313_v38 }
  0x65   : > { %v321_v54 = vrot.slane %v307_v52, %v313_v38 }
  0x67   : > { %v322_v56 = vcombine.low %v314_v53, %v321_v54 }
  0x69   : > { %v324_v57 = vadd.f32 %v322_v56, %v296_v55 }
  0x6b   : > { %325 = vst [vmem:[#allocation5] sm:$0xff] %v324_v57 }
  0x6c   : > { %488 = shalt.err (!%p485_p10)
}
  0x6d   : > { %400 = dma.vmem_to_hbm [thread:$0]  (%p408_p8), %s334_s15, 128, %s703_s1, [#allocation4]  }
  0x6e   : > { %520 = dma.done.wait (%p408_p8), [#allocation4], 128  }
  0x6f   : > { %522 = vsyncadd (%p408_p8), [#allocation4], 4294967168 }
  0x70 PF: > { %p12_p12 = scmp.ge.s32.totalorder %s577_s11, 4   ;;  %s709_s6 = smov %s529_s7 }
  0x71   : > { %s710_s7 = smov %s533_s8  ;;  %s711_s8 = smov %s587_s14 }
  0x72   : > { %s712_s9 = smov %s577_s11  ;;  %14 = sbr.rel (!%p12_p12) target bundleno = 4 (0x4), region = 65 }
  0x77   :  { %346 = vsyncpa [#allocation3], 1 }
  0x78   :  { %348 = vsyncpa [#allocation3 + $0x1], 1 }
  0x79   :  { %349 = vsyncpa [#allocation4], 1 }
  0x7a   :  { %351 = vsyncpa [#allocation4 + $0x1], 1 }

</bundles_post_ra>
